<compile_context>
chip_gen: v7x
topology: tpu7x:2x2x1
jax: 0.10.0
libtpu: 0.0.40
codegen_flags: <defaults>
</compile_context>

<pallas_src>
import functools

import jax
import jax.numpy as jnp
from jax.experimental import pallas as pl
from jax.experimental.pallas import tpu as pltpu


# --------------------------------------------------------------------------
# Hardware / budget helpers
# --------------------------------------------------------------------------
def _default_vmem_limit_bytes():
    """Generation-aware VMEM request: ~80% of physical per-core VMEM."""
    cap = None
    try:
        info = pltpu.get_tpu_info()
        cap = (getattr(info, "vmem_capacity_bytes", None)
               or getattr(info, "vmem_bytes", None))
    except Exception:
        cap = None
    if not cap:
        cap = 128 * 1024 * 1024            # v5e / v6e physical VMEM
    return max(32 * 1024 * 1024, int(cap * 0.80))


def _pick_l_tile(L, c, itemsize, tile_budget_bytes):
    """Largest lane-dense (multiple-of-128) Lt whose (1, c, Lt) tile fits budget."""
    per_lane = max(1, c * itemsize)
    lt = (tile_budget_bytes // per_lane // 128) * 128
    lt = max(lt, 128)
    if lt >= L:
        return L                            # whole length: block == full dim
    return lt


def _x_spec(block_shape, index_map, tile_bytes, *, small_tile_bytes=512 * 1024,
            depth=3):
    """x BlockSpec; for small tiles request 3-deep buffering so the ~0.35us
    per-grid-step overhead does not expose DMA latency."""
    if tile_bytes < small_tile_bytes:
        try:
            return pl.BlockSpec(block_shape, index_map,
                                pipeline_mode=pl.Buffered(depth))
        except Exception:                   # older jax without pipeline_mode
            pass
    return pl.BlockSpec(block_shape, index_map)


# --------------------------------------------------------------------------
# Kernels
# --------------------------------------------------------------------------
def _se_fused_kernel(x_ref, w1t_ref, w2t_ref, o_ref):
    # x: (1, c, L) native dtype; w1t: (c, h) f32 (1/L folded in); w2t: (h, c) f32.
    x = x_ref[...]
    y = jnp.sum(x, axis=-1, dtype=jnp.float32)                       # (1, c)
    h = jnp.maximum(jnp.dot(y, w1t_ref[...],
                            preferred_element_type=jnp.float32), 0.0)
    g = jax.nn.sigmoid(jnp.dot(h, w2t_ref[...],
                               preferred_element_type=jnp.float32))
    o_ref[...] = x * g[:, :, None].astype(o_ref.dtype)               # native-dtype scale


def _se_sum_kernel(x_ref, s_ref, acc_ref, *, l_tile, length, ragged):
    # grid = (bs, n_l); L-reduction axis last, marked "arbitrary".
    l = pl.program_id(1)

    @pl.when(l == 0)
    def _():
        acc_ref[...] = jnp.zeros_like(acc_ref)

    x = x_ref[...]
    if ragged:
        # Mask lanes past the real length on the (padded) boundary tile.
        lane = jax.lax.broadcasted_iota(jnp.int32, x.shape, 2)
        x = jnp.where(lane < (length - l * l_tile), x, jnp.zeros_like(x))

    # keepdims keeps c on sublanes -> no per-tile cross-lane relayout.
    acc_ref[...] += jnp.sum(x, axis=-1, keepdims=True, dtype=jnp.float32)

    @pl.when(l == pl.num_programs(1) - 1)
    def _():
        s_ref[...] = acc_ref[...]                                     # (1, c, 1) f32


def _se_excite_kernel(s_ref, w1t_ref, w2t_ref, g_ref):
    # One batched gate computation for all bs rows (no per-batch matmul tail).
    y = jnp.squeeze(s_ref[...], axis=-1)                              # (bs, c) f32 sums
    h = jnp.maximum(jnp.dot(y, w1t_ref[...],
                            preferred_element_type=jnp.float32), 0.0)
    g = jax.nn.sigmoid(jnp.dot(h, w2t_ref[...],
                               preferred_element_type=jnp.float32))
    g_ref[...] = g[:, :, None]                                        # (bs, c, 1) f32


def _se_scale_kernel(x_ref, g_ref, o_ref):
    # x: (1, c, Lt); g: (1, c, 1) -> lane broadcast, native-dtype multiply.
    o_ref[...] = x_ref[...] * g_ref[...].astype(o_ref.dtype)


# --------------------------------------------------------------------------
# pallas_call wrappers
# --------------------------------------------------------------------------
def _se_fused(x, w1t, w2t, vmem_limit, donate_x):
    bs, c, L = x.shape
    hidden = w1t.shape[1]
    itemsize = x.dtype.itemsize
    cost = pl.CostEstimate(
        flops=2 * bs * c * L + 4 * bs * c * hidden,
        transcendentals=bs * c,
        bytes_accessed=2 * bs * c * L * itemsize + 2 * c * hidden * 4,
    )
    return pl.pallas_call(
        _se_fused_kernel,
        out_shape=jax.ShapeDtypeStruct((bs, c, L), x.dtype),
        grid_spec=pltpu.PrefetchScalarGridSpec(
            num_scalar_prefetch=0,
            grid=(bs,),
            in_specs=[
                pl.BlockSpec((1, c, L), lambda b: (b, 0, 0)),
                pl.BlockSpec((c, hidden), lambda b: (0, 0)),
                pl.BlockSpec((hidden, c), lambda b: (0, 0)),
            ],
            out_specs=pl.BlockSpec((1, c, L), lambda b: (b, 0, 0)),
        ),
        compiler_params=pltpu.CompilerParams(
            dimension_semantics=("parallel",),
            vmem_limit_bytes=vmem_limit,
        ),
        cost_estimate=cost,
        input_output_aliases={0: 0} if donate_x else {},
    )(x, w1t, w2t)


def _se_sum(x, l_tile, vmem_limit):
    bs, c, L = x.shape
    itemsize = x.dtype.itemsize
    n_l = pl.cdiv(L, l_tile)
    ragged = (L % l_tile) != 0
    kernel = functools.partial(_se_sum_kernel, l_tile=l_tile, length=L,
                               ragged=ragged)
    cost = pl.CostEstimate(
        flops=bs * c * L,
        transcendentals=0,
        bytes_accessed=bs * c * L * itemsize + bs * c * 4,
    )
    return pl.pallas_call(
        kernel,
        out_shape=jax.ShapeDtypeStruct((bs, c, 1), jnp.float32),
        grid_spec=pltpu.PrefetchScalarGridSpec(
            num_scalar_prefetch=0,
            grid=(bs, n_l),
            in_specs=[
                _x_spec((1, c, l_tile), lambda b, l: (b, 0, l),
                        c * l_tile * itemsize),
            ],
            out_specs=pl.BlockSpec((1, c, 1), lambda b, l: (b, 0, 0)),
            scratch_shapes=[pltpu.VMEM((1, c, 1), jnp.float32)],
        ),
        compiler_params=pltpu.CompilerParams(
            dimension_semantics=("parallel", "arbitrary"),
            vmem_limit_bytes=vmem_limit,
        ),
        cost_estimate=cost,
    )(x)


def _se_excite(s, w1t, w2t, vmem_limit):
    bs, c, _ = s.shape
    return pl.pallas_call(
        _se_excite_kernel,
        out_shape=jax.ShapeDtypeStruct((bs, c, 1), jnp.float32),
        in_specs=[
            pl.BlockSpec(memory_space=pltpu.MemorySpace.VMEM),
            pl.BlockSpec(memory_space=pltpu.MemorySpace.VMEM),
            pl.BlockSpec(memory_space=pltpu.MemorySpace.VMEM),
        ],
        out_specs=pl.BlockSpec(memory_space=pltpu.MemorySpace.VMEM),
        compiler_params=pltpu.CompilerParams(vmem_limit_bytes=vmem_limit),
    )(s, w1t, w2t)


def _se_scale(x, g, l_tile, vmem_limit, donate_x):
    bs, c, L = x.shape
    itemsize = x.dtype.itemsize
    n_l = pl.cdiv(L, l_tile)
    cost = pl.CostEstimate(
        flops=bs * c * L,
        transcendentals=0,
        bytes_accessed=2 * bs * c * L * itemsize + bs * c * 4,
    )
    return pl.pallas_call(
        _se_scale_kernel,
        out_shape=jax.ShapeDtypeStruct((bs, c, L), x.dtype),
        grid_spec=pltpu.PrefetchScalarGridSpec(
            num_scalar_prefetch=0,
            grid=(bs, n_l),
            in_specs=[
                _x_spec((1, c, l_tile), lambda b, l: (b, 0, l),
                        c * l_tile * itemsize),
                pl.BlockSpec((1, c, 1), lambda b, l: (b, 0, 0)),
            ],
            out_specs=pl.BlockSpec((1, c, l_tile), lambda b, l: (b, 0, l)),
        ),
        compiler_params=pltpu.CompilerParams(
            dimension_semantics=("parallel", "parallel"),
            vmem_limit_bytes=vmem_limit,
        ),
        cost_estimate=cost,
        input_output_aliases={0: 0} if donate_x else {},
    )(x, g)


# --------------------------------------------------------------------------
# Public entry point
# --------------------------------------------------------------------------
def se_block(x, w1, w2, *, slab_budget_bytes=None, tile_budget_bytes=None,
             vmem_limit_bytes=None, donate_x=False):
    """SE block forward.  x: (bs, c, L);  w1: (c//r, c);  w2: (c, c//r)."""
    bs, c, L = x.shape
    hidden, c1 = w1.shape
    assert c1 == c and w2.shape == (c, hidden)

    # Pre-transpose the tiny weights and fold the 1/L of the mean into the
    # first linear layer (removes a full-(bs, c) multiply in the kernel).
    w1t = jnp.transpose(w1).astype(jnp.float32) * (1.0 / L)    # (c, hidden)
    w2t = jnp.transpose(w2).astype(jnp.float32)                # (hidden, c)

    itemsize = x.dtype.itemsize
    vmem_limit = (vmem_limit_bytes if vmem_limit_bytes is not None
                  else _default_vmem_limit_bytes())
    weight_bytes = 2 * c * hidden * 4
    headroom = 2 * 1024 * 1024
    # Fused path streams 2 in + 2 out double-buffered (1, c, L) slabs; the
    # two-pass scale leg streams 2 in + 2 out (1, c, Lt) tiles -> budget /4.
    auto_budget = max(512 * 1024, (vmem_limit - weight_bytes - headroom) // 4)
    slab_budget = auto_budget if slab_budget_bytes is None else slab_budget_bytes
    tile_budget = auto_budget if tile_budget_bytes is None else tile_budget_bytes

    slab_bytes = c * L * itemsize
    if slab_bytes <= slab_budget:
        # Per-batch slab fits: single fused pass (2x HBM traffic), pipelined over bs.
        # TODO(synk): add a 2-way core-parallel L split for bs==1 on v7x so the
        # second TensorCore is not idle during the fused / reduce pass.
        return _se_fused(x, w1t, w2t, vmem_limit, donate_x)

    # Two-pass: masked f32 reduce -> one batched excitation -> native-dtype scale.
    l_tile = _pick_l_tile(L, c, itemsize, tile_budget)
    s = _se_sum(x, l_tile, vmem_limit)                  # (bs, c, 1) f32 channel sums
    g = _se_excite(s, w1t, w2t, vmem_limit)             # (bs, c, 1) f32 sigmoid gates
    return _se_scale(x, g, l_tile, vmem_limit, donate_x)


def se_block_ref(x, w1, w2):
    """Pure-JAX reference for correctness checking."""
    xf = x.astype(jnp.float32)
    y = jnp.mean(xf, axis=-1)                                    # (bs, c)
    h = jnp.maximum(y @ w1.astype(jnp.float32).T, 0.0)           # (bs, c//r)
    g = jax.nn.sigmoid(h @ w2.astype(jnp.float32).T)             # (bs, c)
    return (xf * g[:, :, None]).astype(x.dtype)


if __name__ == "__main__":
    key = jax.random.PRNGKey(0)
    kx, k1, k2, k3 = jax.random.split(key, 4)

    # Small shapes consistent with SE_Block(c=64, r=16) on an NCL input.
    bs, c, L, r = 4, 64, 512, 16
    hidden = c // r  # = 4

    x = jax.random.normal(kx, (bs, c, L), dtype=jnp.float32)
    w1 = jax.random.normal(k1, (hidden, c), dtype=jnp.float32) * (1.0 / c) ** 0.5
    w2 = jax.random.normal(k2, (c, hidden), dtype=jnp.float32) * (1.0 / hidden) ** 0.5

    ref = se_block_ref(x, w1, w2)

    # Path 1: fused single-pass (derived budgets easily admit this slab).
    out_fused = jax.block_until_ready(se_block(x, w1, w2))
    assert out_fused.shape == (bs, c, L)
    assert jnp.allclose(out_fused, ref, atol=1e-5, rtol=1e-5), "fused path mismatch"

    # Path 2: forced two-pass reduce -> excite -> scale with 256-wide L tiles.
    out_tiled = jax.block_until_ready(
        se_block(x, w1, w2, slab_budget_bytes=0,
                 tile_budget_bytes=c * 256 * x.dtype.itemsize))
    assert out_tiled.shape == (bs, c, L)
    assert jnp.allclose(out_tiled, ref, atol=1e-5, rtol=1e-5), "two-pass path mismatch"

    # Path 3: ragged L (not a multiple of the 256-wide tile) exercises the masked reduce.
    L2 = 448
    x2 = jax.random.normal(k3, (bs, c, L2), dtype=jnp.float32)
    ref2 = se_block_ref(x2, w1, w2)
    out_ragged = jax.block_until_ready(
        se_block(x2, w1, w2, slab_budget_bytes=0,
                 tile_budget_bytes=c * 256 * x.dtype.itemsize))
    assert out_ragged.shape == (bs, c, L2)
    assert jnp.allclose(out_ragged, ref2, atol=1e-5, rtol=1e-5), "ragged path mismatch"

    # Path 4: fused pass with x aliased to the output (last use of x).
    out_donated = jax.block_until_ready(se_block(x, w1, w2, donate_x=True))
    assert jnp.allclose(out_donated, ref, atol=1e-5, rtol=1e-5), "donated path mismatch"

    print("KERNEL_OK")
</pallas_src>

<mosaic_0001>
module attributes {stable_mosaic.version = 11 : i64} {
  func.func @_se_fused_kernel(%arg0: i32, %arg1: memref<1x64x512xf32, #tpu.memory_space<vmem>>, %arg2: memref<64x4xf32, #tpu.memory_space<vmem>>, %arg3: memref<4x64xf32, #tpu.memory_space<vmem>>, %arg4: memref<1x64x512xf32, #tpu.memory_space<vmem>>) attributes {dimension_semantics = [#tpu.dimension_semantics<parallel>], iteration_bounds = array<i64: 4>, scalar_prefetch = 0 : i64, scratch_operands = 0 : i64, tpu.core_type = #tpu.core_type<tc>, window_params = [{transform_indices = @transform_0, window_bounds = array<i64: 1, 64, 512>}, {pipeline_mode = #tpu.pipeline_mode<synchronous>, transform_indices = @transform_1, window_bounds = array<i64: 64, 4>}, {pipeline_mode = #tpu.pipeline_mode<synchronous>, transform_indices = @transform_2, window_bounds = array<i64: 4, 64>}, {transform_indices = @transform_3, window_bounds = array<i64: 1, 64, 512>}]} {
    %c0 = arith.constant 0 : index
    %c0_0 = arith.constant 0 : index
    %c0_1 = arith.constant 0 : index
    %0 = vector.load %arg1[%c0, %c0_0, %c0_1] : memref<1x64x512xf32, #tpu.memory_space<vmem>>, vector<1x64x512xf32>
    %cst = arith.constant dense<0.000000e+00> : vector<1x64xf32>
    %1 = vector.multi_reduction <add>, %0, %cst [2] : vector<1x64x512xf32> to vector<1x64xf32>
    %c0_2 = arith.constant 0 : index
    %c0_3 = arith.constant 0 : index
    %2 = vector.load %arg2[%c0_2, %c0_3] : memref<64x4xf32, #tpu.memory_space<vmem>>, vector<64x4xf32>
    %cst_4 = arith.constant dense<0.000000e+00> : vector<1x4xf32>
    %3 = tpu.matmul %1, %2, %cst_4 {dimension_numbers = #tpu.dot_dimension_numbers<[1], [0], [0], [1], [0, 0, 1, 1], [], []>} : vector<1x64xf32>, vector<64x4xf32>, vector<1x4xf32> -> vector<1x4xf32>
    %cst_5 = arith.constant 0.000000e+00 : f32
    %4 = vector.broadcast %cst_5 : f32 to vector<1x4xf32>
    %5 = arith.maximumf %3, %4 : vector<1x4xf32>
    %c0_6 = arith.constant 0 : index
    %c0_7 = arith.constant 0 : index
    %6 = vector.load %arg3[%c0_6, %c0_7] : memref<4x64xf32, #tpu.memory_space<vmem>>, vector<4x64xf32>
    %cst_8 = arith.constant dense<0.000000e+00> : vector<1x64xf32>
    %7 = tpu.matmul %5, %6, %cst_8 {dimension_numbers = #tpu.dot_dimension_numbers<[1], [0], [0], [1], [0, 0, 1, 1], [], []>} : vector<1x4xf32>, vector<4x64xf32>, vector<1x64xf32> -> vector<1x64xf32>
    %8 = arith.negf %7 : vector<1x64xf32>
    %9 = math.exp %8 : vector<1x64xf32>
    %cst_9 = arith.constant 1.000000e+00 : f32
    %10 = vector.broadcast %cst_9 : f32 to vector<1x64xf32>
    %11 = arith.addf %10, %9 : vector<1x64xf32>
    %12 = arith.divf %10, %11 : vector<1x64xf32>
    %13 = vector.shape_cast %12 : vector<1x64xf32> to vector<1x64x1xf32>
    %14 = vector.broadcast %13 : vector<1x64x1xf32> to vector<1x64x512xf32>
    %15 = arith.mulf %0, %14 : vector<1x64x512xf32>
    %c0_10 = arith.constant 0 : index
    %c0_11 = arith.constant 0 : index
    %c0_12 = arith.constant 0 : index
    %16 = vector.load %arg4[%c0_10, %c0_11, %c0_12] : memref<1x64x512xf32, #tpu.memory_space<vmem>>, vector<1x64x512xf32>
    tpu.vector_store %arg4[%c0_10, %c0_11, %c0_12], %15 {strides = array<i32>} : memref<1x64x512xf32, #tpu.memory_space<vmem>>, vector<1x64x512xf32>,
    return
  }
  func.func @transform_0(%arg0: i32) -> (i32, i32, i32) {
    %c0_i32 = arith.constant 0 : i32
    %c0_i32_0 = arith.constant 0 : i32
    %c0_i32_1 = arith.constant 0 : i32
    return %arg0, %c0_i32, %c0_i32_0 : i32, i32, i32
  }
  func.func @transform_1(%arg0: i32) -> (i32, i32) {
    %c0_i32 = arith.constant 0 : i32
    %c0_i32_0 = arith.constant 0 : i32
    %c0_i32_1 = arith.constant 0 : i32
    return %c0_i32, %c0_i32_0 : i32, i32
  }
  func.func @transform_2(%arg0: i32) -> (i32, i32) {
    %c0_i32 = arith.constant 0 : i32
    %c0_i32_0 = arith.constant 0 : i32
    %c0_i32_1 = arith.constant 0 : i32
    return %c0_i32, %c0_i32_0 : i32, i32
  }
  func.func @transform_3(%arg0: i32) -> (i32, i32, i32) {
    %c0_i32 = arith.constant 0 : i32
    %c0_i32_0 = arith.constant 0 : i32
    %c0_i32_1 = arith.constant 0 : i32
    return %arg0, %c0_i32, %c0_i32_0 : i32, i32, i32
  }
}

</mosaic_0001>

<bundles_post_ra>
// kernel: tpu_custom_call.1
= control target key start
LH: loop header
LB: loop body
LE: loop exit
PB: predicated region body
PF: predicated region fallthrough
CT: control target
= control target key end

     0   :  { %8 = vsyncpa [#allocation3], 0  ;;  %s1502_s0 = inlined_call_operand.hbm [shape: f32[4,64,512], index: 0, kind: input, shape index: {}]   ;;  %s1503_s1 = inlined_call_operand.hbm [shape: f32[64,4], index: 1, kind: input, shape index: {}]   ;;  %s1504_s2 = inlined_call_operand.hbm [shape: f32[4,64], index: 2, kind: input, shape index: {}]   ;;  %s1505_s3 = inlined_call_operand.hbm [shape: f32[4,64,512], index: 3, kind: output, shape index: {}]  }
   0x1   :  { %10 = vsyncpa [#allocation3 + $0x1], 0 }
   0x2   :  { %11 = vsyncpa [#allocation6], 0 }
   0x3   :  { %12 = vsyncpa [#allocation4], 0 }
   0x4   :  { %14 = vsyncpa [#allocation4 + $0x1], 0  ;;  %s1065_s12 = smov 0   ;;  %s1067_s13 = smov 0  }
   0x5   :  { %s1069_s14 = smov 0   ;;  %s1071_s15 = smov 0  }
   0x6 LB: > { %s1086_s16 = sadd.s32 4294967295, %s1030_s15   ;;  %s723_s17 = sadd.s32 4294967294, %s1030_s15   ;;  %s1030_s15 = sphi %s1071_s15, %s1524_s15   ;;  %s1026_s14 = sphi %s1069_s14, %s1523_s14   ;;  %s1022_s13 = sphi %s1067_s13, %s1522_s13   ;;  %s1018_s12 = sphi %s1065_s12, %s1521_s12  }
   0x7   : > { %p40_p0 = scmp.ne.s32.totalorder %s1022_s13, %s1018_s12  ;;  %p1506_p1 = scmp.eq.s32.totalorder %s1086_s16, 0 }
   0x8   : > { %p112_p3 = scmp.eq.s32.totalorder %s723_s17, 3  ;;  %p724_p5 = scmp.ge.s32.totalorder %s1030_s15, 1 }
   0x9   : > { %p1095_p4 = por %p1506_p1, %p40_p0  ;;  %p119_p7 = scmp.lt.s32.totalorder %s1030_s15, 5 }
   0xa   : > { %p1100_p6 = por %p112_p3, %p40_p0  ;;  %s1032_s21 = smov [#allocation5]  }
   0xb   : > { %s1509_s18 = scalar_select %p1095_p4, 1, 0 }
   0xc   : > { %s1510_s19 = scalar_select %p1100_p6, 1, 0 }
   0xd   : > { %p1105_p8 = pnand %p724_p5, %p119_p7  ;;  %s131_s22 = sshll.u32 %s1032_s21, 4  ;;  %s132_s22 = int_to_ptr.vmem [resolvable:$true] %s131_s22 }
   0xe   : > { %s1033_s24 = smov [#allocation7]   ;;  %s874_s28 = scalar_lea.hbm %s1503_s1, 1024 }
   0xf   : > { %s1511_s20 = scalar_select %p1105_p8, 1, 0 }
  0x10   : > { %p806_p9 = pneg %p1105_p8  ;;  %s145_s25 = sshll.u32 %s1033_s24, 4  ;;  %s1117_s25 = int_to_ptr.vmem [resolvable:$true] %s145_s25 }
  0x11   : > { %p875_p11 = scmp.ne.s32.totalorder %s1503_s1, %s874_s28  ;;  %p881_p3 = scmp.lt.u32.totalorder %s874_s28, %s1503_s1 }
  0x12   : > { %p1113_p10 = pnand %p806_p9, %p1506_p1 }
  0x14   : > { %p876_p12 = pneg %p1113_p10 }
  0x16   : > { %p877_p13 = pnand %p876_p12, %p875_p11 }
  0x18   : > { %p878_p0 = pneg %p877_p13 }
  0x1a   : > { %p883_p5 = pnand %p881_p3, %p878_p0 }
  0x1c   : > { %886 = shalt.err (!%p883_p5)
}
  0x1d   : > { %s887_s6 = scalar_lea.vmem %s132_s22, 1024  ;;  %p895_p2 = scmp.lt.s32.totalorder %s132_s22, %s132_s22 }
  0x1e   : > { %p888_p7 = scmp.ne.s32.totalorder %s132_s22, %s887_s6  ;;  %p896_p6 = scmp.lt.s32.totalorder %s887_s6, %s887_s6 }
  0x20   : > { %p890_p9 = pnand %p888_p7, %p876_p12  ;;  %p897_p4 = por %p896_p6, %p895_p2 }
  0x22   : > { %p891_p1 = pneg %p890_p9 }
  0x24   : > { %p898_p8 = pnand %p897_p4, %p891_p1 }
  0x26   : > { %901 = shalt.err (!%p898_p8)
}
  0x27   : > { %s1034_s7 = smov 128   ;;  %s1035_s8 = smov 8  }
  0x28   : > { %809 = dma.hbm_to_vmem [thread:$0]  (!%p1113_p10), %s1503_s1, 1024, %s132_s22, [#allocation6], %s1034_s7, %s1034_s7, %s1035_s8  }
  0x29   : > { %s902_s21 = scalar_lea.hbm %s1504_s2, 64 }
  0x2a   : > { %p903_p11 = scmp.ne.s32.totalorder %s1504_s2, %s902_s21  ;;  %p909_p4 = scmp.lt.u32.totalorder %s902_s21, %s1504_s2 }
  0x2c   : > { %p905_p1 = pnand %p903_p11, %p876_p12 }
  0x2e   : > { %p906_p2 = pneg %p905_p1 }
  0x30   : > { %p911_p6 = pnand %p909_p4, %p906_p2 }
  0x32   : > { %914 = shalt.err (!%p911_p6)
}
  0x33   : > { %s915_s22 = scalar_lea.vmem %s1117_s25, 64  ;;  %p923_p3 = scmp.lt.s32.totalorder %s1117_s25, %s1117_s25 }
  0x34   : > { %p916_p8 = scmp.ne.s32.totalorder %s1117_s25, %s915_s22  ;;  %p924_p5 = scmp.lt.s32.totalorder %s915_s22, %s915_s22 }
  0x36   : > { %p918_p13 = pnand %p916_p8, %p876_p12  ;;  %p925_p7 = por %p924_p5, %p923_p3 }
  0x38   : > { %p919_p0 = pneg %p918_p13 }
  0x3a   : > { %p926_p9 = pnand %p925_p7, %p919_p0 }
  0x3c   : > { %929 = shalt.err (!%p926_p9)
}
  0x3d   : > { %812 = dma.hbm_to_vmem [thread:$0]  (!%p1113_p10), %s1504_s2, 64, %s1117_s25, [#allocation6]  }
  0x3e   : > { %s1167_s4 = sadd.s32 1, %s1030_s15   ;;  %s27_s23 = sadd.s32 1, %s1026_s14 }
  0x3f   : > { %s24_s5 = ssub.s32 %s1030_s15, %s1167_s4  ;;  %p34_p12 = scmp.ne.s32.totalorder %s1026_s14, %s1022_s13 }
  0x40   : > { %p25_p11 = scmp.eq.s32.totalorder %s24_s5, 0  ;;  %p35_p1 = scmp.eq.s32.totalorder %s1030_s15, 0 }
  0x41   : > { %p1513_p2 = scmp.eq.s32.totalorder %s1086_s16, 3  ;;  %p823_p6 = scmp.lt.s32.totalorder %s1030_s15, 4 }
  0x42   : > { %s1183_s7 = scalar_select %p25_p11, %s1026_s14, %s27_s23  }
  0x43   : > { %p1177_p4 = por %p1513_p2, %p34_p12  ;;  %p36_p8 = por %p35_p1, %p34_p12 }
  0x44   : > { %s156_s8 = sand.u32 1, %s1026_s14   ;;  %s745_s25 = sshll.u32 %s1030_s15, 12 }
  0x45   : > { %s728_s9 = sshll.u32 %s156_s8, 8  ;;  %s1190_s17 = scalar_lea.hbm %s1502_s0, %s745_s25 }
  0x46   : > { %s160_s21 = scalar_lea.vmem [#allocation2], %s728_s9  ;;  %p1194_p10 = pnand %p823_p6, %p36_p8 }
  0x47   : > { %s167_s24 = sshll.u32 %s160_s21, 4  ;;  %s1198_s27 = scalar_lea.sflag [#allocation3], %s156_s8  ;;  %s1192_s24 = int_to_ptr.vmem [resolvable:$true] %s167_s24 }
  0x48   : > { %s930_s28 = scalar_lea.hbm %s1190_s17, 4096  ;;  %p932_p0 = pneg %p1194_p10 }
  0x49   : > { %p931_p13 = scmp.ne.s32.totalorder %s1190_s17, %s930_s28  ;;  %s935_s30 = scalar_lea.hbm %s1502_s0, 16384 }
  0x4a   : > { %p936_p7 = scmp.lt.u32.totalorder %s1190_s17, %s1502_s0  ;;  %p937_p9 = scmp.lt.u32.totalorder %s935_s30, %s930_s28 }
  0x4b   : > { %p933_p3 = pnand %p932_p0, %p931_p13  ;;  %p939_p11 = scmp.lt.u32.totalorder %s930_s28, %s1190_s17 }
  0x4c   : > { %p938_p12 = por %p937_p9, %p936_p7 }
  0x4d   : > { %p934_p5 = pneg %p933_p3 }
  0x4e   : > { %p940_p1 = por %p939_p11, %p938_p12 }
  0x50   : > { %p941_p2 = pnand %p940_p1, %p934_p5 }
  0x52   : > { %944 = shalt.err (!%p941_p2)
}
  0x53   : > { %s945_s8 = scalar_lea.vmem %s1192_s24, 4096  ;;  %s1036_s9 = smov [#allocation2]  }
  0x54   : > { %p946_p6 = scmp.ne.s32.totalorder %s1192_s24, %s945_s8  ;;  %s950_s25 = sshll.u32 %s1036_s9, 4  ;;  %s951_s25 = int_to_ptr.vmem [resolvable:$false] %s950_s25 }
  0x55   : > { %s952_s10 = scalar_lea.vmem %s951_s25, 8192  ;;  %p953_p3 = scmp.lt.s32.totalorder %s1192_s24, %s951_s25 }
  0x56   : > { %p948_p8 = pnand %p946_p6, %p932_p0  ;;  %p954_p7 = scmp.lt.s32.totalorder %s952_s10, %s945_s8 }
  0x58   : > { %p949_p13 = pneg %p948_p8  ;;  %p955_p9 = por %p954_p7, %p953_p3 }
  0x5a   : > { %p956_p12 = pnand %p955_p9, %p949_p13 }
  0x5c   : > { %959 = shalt.err (!%p956_p12)
}
  0x5d   : > { %s1037_s11 = smov 512   ;;  %s1038_s21 = smov 32  }
  0x5e   : > { %816 = dma.hbm_to_vmem [thread:$0]  (!%p1194_p10), %s1190_s17, 4096, %s1192_s24, %s1198_s27, %s1037_s11, %s1037_s11, %s1038_s21  }
  0x5f   : > { %p1516_p0 = scmp.ne.s32.totalorder %s1511_s20, 0 }
  0x60   : > { %s1229_s28 = sand.u32 (!%p1516_p0), 1, %s1022_s13   ;;  %p1517_p5 = scmp.ne.s32.totalorder (!%p1516_p0), %s1509_s18, 0 }
  0x61   : > { %179 = sbr.rel (%p1516_p0) target bundleno = 876 (0x36c), region = 32  ;;  %s732_s22 = sshll.u32 (!%p1516_p0), %s1229_s28, 8 }
  0x62   : > { %s182_s29 = scalar_lea.sflag (!%p1516_p0), [#allocation3], %s1229_s28  ;;  %s1235_s30 = scalar_lea.vmem (!%p1516_p0), [#allocation2], %s732_s22 }
  0x68   : > { %1005 = dma.done.wait (%p1517_p5), %s182_s29, 4096  }
  0x69   : > { %1007 = vsyncadd (%p1517_p5), %s182_s29, 4294963200  ;;  %p1518_p10 = scmp.eq.s32.totalorder %s1086_s16, 0 }
  0x6b   : > { %1009 = dma.done.wait (%p1518_p10), [#allocation6], 1088   ;;  %p1519_p11 = pmov %p1518_p10 }
  0x6c   : > { %v1246_v0 = vld [vmem:[%s1235_s30] sm:$0xff]  ;;  %v1249_v1 = vld [vmem:[%s1235_s30 + $0x8] sm:$0xff]  ;;  %v1252_v2 = vld [vmem:[%s1235_s30 + $0x10] sm:$0xff]  ;;  %v1039_v59 = vmov 0.0|0.0   ;;  %vm1040_vm0 = vmmov 0   ;;  %vm315_vm1 = vcmask 130112  }
  0x6d   : > { %1011 = vsyncadd (%p1519_p11), [#allocation6], 4294966208  ;;  %v248_v3 = vadd.f32 %v1249_v1, %v1246_v0  ;;  %v1257_v4 = vld [vmem:[%s1235_s30 + $0x40] sm:$0xff]  ;;  %v1260_v5 = vld [vmem:[%s1235_s30 + $0x48] sm:$0xff]  ;;  %782 = vmatprep.subr.bf16.mxu0 %v1039_v59  ;;  %vm322_vm2 = vcmask 195712   ;;  %vm329_vm3 = vcmask 261312  }
  0x6e   : > { %v1263_v6 = vld [vmem:[%s1235_s30 + $0x18] sm:$0xff]  ;;  %v1266_v7 = vld [vmem:[%s1235_s30 + $0x50] sm:$0xff]  ;;  %v258_v8 = vadd.f32 %v1260_v5, %v1257_v4  ;;  %v1271_v9 = vld [vmem:[%s1235_s30 + $0x20] sm:$0xff]  ;;  %vm336_vm4 = vcmask 326912   ;;  %vm343_vm5 = vcmask 392512   ;;  %vm350_vm6 = vcmask 458112  }
  0x6f   : > { %v249_v10 = vadd.f32 %v248_v3, %v1252_v2  ;;  %v1275_v11 = vld [vmem:[%s1235_s30 + $0x58] sm:$0xff]  ;;  %v1278_v12 = vld [vmem:[%s1235_s30 + $0x28] sm:$0xff]  ;;  %v1281_v13 = vld [vmem:[%s1235_s30 + $0x30] sm:$0xff]  ;;  %vm357_vm7 = vcmask 523712   ;;  %vm359_vm8 = vcmask 523264   ;;  %vm438_vm9 = vcmask 1043456  }
  0x70   : > { %v259_v14 = vadd.f32 %v258_v8, %v1266_v7  ;;  %v253_v15 = vadd.f32 %v1278_v12, %v1271_v9  ;;  %v1287_v16 = vld [vmem:[%s1235_s30 + $0x60] sm:$0xff]  ;;  %v1290_v17 = vld [vmem:[%s1235_s30 + $0x68] sm:$0xff]  ;;  %v1293_v18 = vld [vmem:[%s1235_s30 + $0x70] sm:$0xff]  ;;  %vm434_vm10 = vcmask 31744   ;;  %s1394_s18 = scalar_lea.vmem [#allocation8], %s732_s22  ;;  %s746_s20 = sshll.u32 %s1086_s16, 12 }
  0x71   : > { %v250_v19 = vadd.f32 %v249_v10, %v1263_v6  ;;  %v1297_v20 = vld [vmem:[%s1235_s30 + $0x38] sm:$0xff]  ;;  %v263_v21 = vadd.f32 %v1290_v17, %v1287_v16  ;;  %v1302_v22 = vld [vmem:[%s1235_s30 + $0x80] sm:$0xff]  ;;  %v1305_v23 = vld [vmem:[%s1235_s30 + $0x88] sm:$0xff]  ;;  %s631_s17 = sshll.u32 %s1394_s18, 4  ;;  %s1449_s27 = scalar_lea.hbm %s1505_s3, %s746_s20  ;;  %s1451_s17 = int_to_ptr.vmem [resolvable:$true] %s631_s17 }
  0x72   : > { %v260_v24 = vadd.f32 %v259_v14, %v1275_v11  ;;  %v254_v25 = vadd.f32 %v253_v15, %v1281_v13  ;;  %v1310_v26 = vld [vmem:[%s1235_s30 + $0x78] sm:$0xff]  ;;  %v1313_v27 = vld [vmem:[%s1235_s30 + $0x90] sm:$0xff]  ;;  %v268_v28 = vadd.f32 %v1305_v23, %v1302_v22  ;;  %v1318_v29 = vld [vmem:[%s1235_s30 + $0xa0] sm:$0xff]  ;;  %s618_s16 = scalar_lea.sflag [#allocation4], %s1229_s28  ;;  %s960_s23 = scalar_lea.vmem %s1451_s17, 4096 }
  0x73   : > { %251 = vadd.xlane.f32.xlu0 %v250_v19  ;;  %v264_v30 = vadd.f32 %v263_v21, %v1293_v18  ;;  %v1322_v31 = vld [vmem:[%s1235_s30 + $0x98] sm:$0xff]  ;;  %v1325_v32 = vld [vmem:[%s1235_s30 + $0xa8] sm:$0xff]  ;;  %v1328_v33 = vld [vmem:[%s1235_s30 + $0xb0] sm:$0xff]  ;;  %v1041_v19 = vmov 0.0   ;;  %v304_v21 = vlaneseq  ;;  %p961_p1 = scmp.ne.s32.totalorder %s1451_s17, %s960_s23  ;;  %s1042_s5 = smov [#allocation8]  }
  0x74   : > { %261 = vadd.xlane.f32.xlu1 %v260_v24  ;;  %v255_v34 = vadd.f32 %v254_v25, %v1297_v20  ;;  %v269_v35 = vadd.f32 %v268_v28, %v1313_v27  ;;  %v273_v36 = vadd.f32 %v1325_v32, %v1318_v29  ;;  %v1335_v37 = vld [vmem:[%s1235_s30 + $0xc0] sm:$0xff]  ;;  %v1338_v38 = vld [vmem:[%s1235_s30 + $0xc8] sm:$0xff]  ;;  %v1341_v39 = vld [vmem:[%s1235_s30 + $0xd0] sm:$0xff]  ;;  %774 = vmatprep.mubr.msk.f32.mxu0 %vm1040_vm0, %v1041_v19  ;;  %s964_s8 = sshll.u32 %s1042_s5, 4  ;;  %s965_s8 = int_to_ptr.vmem [resolvable:$false] %s964_s8 }
  0x75   : > { %v265_v40 = vadd.f32 %v264_v30, %v1310_v26  ;;  %v1345_v41 = vld [vmem:[%s1235_s30 + $0xb8] sm:$0xff]  ;;  %v278_v42 = vadd.f32 %v1338_v38, %v1335_v37  ;;  %v1350_v43 = vld [vmem:[%s1235_s30 + $0xe0] sm:$0xff]  ;;  %v1353_v44 = vld [vmem:[%s1235_s30 + $0xe8] sm:$0xff]  ;;  %777 = vmatprep.subr.mxu1 %v1041_v19  ;;  %779 = vmatprep.mubr.msk.f32.mxu1 %vm1040_vm0, %v1041_v19  ;;  %v305_v24 = vand.u32 127, %v304_v21  ;;  %v1373_v25 = vshrl.u32 %v304_v21, 7  ;;  %p962_p2 = pnand %p961_p1, %p1177_p4  ;;  %s966_s9 = scalar_lea.vmem %s965_s8, 8192 }
  0x76   : > { %v274_v45 = vadd.f32 %v273_v36, %v1328_v33  ;;  %v1357_v46 = vld [vmem:[%s1235_s30 + $0xf0] sm:$0xff]  ;;  %v283_v47 = vadd.f32 %v1353_v44, %v1350_v43  ;;  %v270_v48 = vadd.f32 %v269_v35, %v1322_v31  ;;  %v1365_v51 = vld [vmem:[%s1235_s30 + $0xd8] sm:$0xff]  ;;  %v288_v56 = vld [vmem:[#allocation5] sm:$0xff]  ;;  %p967_p8 = scmp.lt.s32.totalorder %s1451_s17, %s965_s8  ;;  %p968_p13 = scmp.lt.s32.totalorder %s966_s9, %s960_s23 }
  0x77   : > { %256 = vadd.xlane.f32.xlu0 %v255_v34  ;;  %v279_v49 = vadd.f32 %v278_v42, %v1341_v39  ;;  %v1369_v53 = vld [vmem:[%s1235_s30 + $0xf8] sm:$0xff]  ;;  %v289_v57 = vld [vmem:[#allocation5 + $0x8] sm:$0xff]  ;;  %v290_v60 = vld [vmem:[#allocation5 + $0x10] sm:$0xff]  ;;  %v310_v28 = vadd.s32 4294967288, %v305_v24  ;;  %v317_v30 = vadd.s32 4294967280, %v305_v24  ;;  %v324_v34 = vadd.s32 4294967272, %v305_v24  ;;  %p963_p6 = pneg %p962_p2 }
  0x78   : > { %266 = vadd.xlane.f32.xlu1 %v265_v40  ;;  %v275_v50 = vadd.f32 %v274_v45, %v1345_v41  ;;  %v284_v52 = vadd.f32 %v283_v47, %v1357_v46  ;;  %v783_v58 = vpack.c.bf16 %v289_v57, %v288_v56  ;;  %v291_v61 = vld [vmem:[#allocation5 + $0x18] sm:$0xff]  ;;  %v292_v63 = vld [vmem:[#allocation5 + $0x20] sm:$0xff]  ;;  %v293_v3 = vld [vmem:[#allocation5 + $0x28] sm:$0xff]  ;;  %v308_v36 = vsub.s32 %v305_v24, %v1373_v25  ;;  %p969_p3 = por %p968_p13, %p967_p8 }
  0x79   : > { %v280_v54 = vadd.f32 %v279_v49, %v1365_v51  ;;  %v786_v62 = vpack.c.bf16 %v291_v61, %v290_v60  ;;  %v789_v8 = vpack.c.bf16 %v293_v3, %v292_v63  ;;  %v294_v10 = vld [vmem:[#allocation5 + $0x30] sm:$0xff]  ;;  %v295_v14 = vld [vmem:[#allocation5 + $0x38] sm:$0xff]  ;;  %v313_v42 = vsub.s32 %v310_v28, %v1373_v25 }
  0x7a   : > { %v285_v55 = vadd.f32 %v284_v52, %v1369_v53  ;;  %784 = vmatpush3.bf16.msra.mxu0 %v783_v58  ;;  %v792_v15 = vpack.c.bf16 %v295_v14, %v294_v10  ;;  %v331_v45 = vadd.s32 4294967264, %v305_v24  ;;  %v320_v47 = vsub.s32 %v317_v30, %v1373_v25  ;;  %p970_p7 = pnand %p969_p3, %p963_p6 }
  0x7b   : > { %271 = vadd.xlane.f32.xlu0 %v270_v48  ;;  %785 = vmatprep.subr.bf16.mxu0 %v1039_v59  ;;  %v327_v48 = vsub.s32 %v324_v34, %v1373_v25  ;;  %v338_v49 = vadd.s32 4294967256, %v305_v24  ;;  %v345_v57 = vadd.s32 4294967248, %v305_v24  ;;  %v352_v61 = vadd.s32 4294967240, %v305_v24 }
  0x7c   : > { %276 = vadd.xlane.f32.xlu1 %v275_v50  ;;  %v334_v56 = vsub.s32 %v331_v45, %v1373_v25  ;;  %v433_v45 = vld [vmem:[#allocation7] sm:$0xf] }
  0x7d   : > { %v341_v60 = vsub.s32 %v338_v49, %v1373_v25  ;;  %v355_v21 = vsub.s32 %v352_v61, %v1373_v25  ;;  %778 = vmatpush3.msk.msra.mxu1 %vm438_vm9, %v433_v45 }
  0x7e   : > { %787 = vmatpush3.bf16.msra.mxu0 %v786_v62 }
  0x7f   : > { %281 = vadd.xlane.f32.xlu0 %v280_v54  ;;  %788 = vmatprep.subr.bf16.mxu0 %v1039_v59 }
  0x80   : > { %286 = vadd.xlane.f32.xlu1 %v285_v55 }
  0x82   : > { %790 = vmatpush3.bf16.msra.mxu0 %v789_v8 }
  0x83   : > { %791 = vmatprep.subr.bf16.mxu0 %v1039_v59 }
  0x86   : > { %793 = vmatpush3.bf16.msra.mxu0 %v792_v15  ;;  %v348_v15 = vsub.s32 %v345_v57, %v1373_v25  ;;  %v520_v57 = vsub.s32 0, %v1373_v25 }
 0x100   : > { %v252_v35 = vpop.xlane.xlu0 %251 }
 0x101   : > { %v262_v40 = vpop.xlane.xlu1 %261  ;;  %v309_v52 = vrot.slane %v252_v35, %v308_v36 }
 0x102   : > { %v321_v58 = vrot.slane %v262_v40, %v320_v47 }
 0x104   : > { %v257_v50 = vpop.xlane.xlu0 %256 }
 0x105   : > { %v314_v54 = vrot.slane %v257_v50, %v313_v42  ;;  %v267_v55 = vpop.xlane.xlu1 %266 }
 0x106   : > { %v328_v59 = vrot.slane %v267_v55, %v327_v48 }
 0x107   : > { %v316_v62 = vsel %vm315_vm1, %v314_v54, %v309_v52 }
 0x108   : > { %v323_v63 = vsel %vm322_vm2, %v321_v58, %v316_v62  ;;  %v272_v3 = vpop.xlane.xlu0 %271 }
 0x109   : > { %v330_v8 = vsel %vm329_vm3, %v328_v59, %v323_v63  ;;  %v335_v10 = vrot.slane %v272_v3, %v334_v56  ;;  %v277_v14 = vpop.xlane.xlu1 %276 }
 0x10a   : > { %v342_v19 = vrot.slane %v277_v14, %v341_v60 }
 0x10b   : > { %v337_v28 = vsel %vm336_vm4, %v335_v10, %v330_v8 }
 0x10c   : > { %v282_v30 = vpop.xlane.xlu0 %281  ;;  %v344_v24 = vsel %vm343_vm5, %v342_v19, %v337_v28 }
 0x10d   : > { %v349_v34 = vrot.slane %v282_v30, %v348_v15  ;;  %v287_v35 = vpop.xlane.xlu1 %286 }
 0x10e   : > { %v356_v36 = vrot.slane %v287_v35, %v355_v21 }
 0x10f   : > { %v351_v40 = vsel %vm350_vm6, %v349_v34, %v344_v24 }
 0x110   : > { %v358_v42 = vsel %vm357_vm7, %v356_v36, %v351_v40 }
 0x111   : > { %775 = vmatmul.mubr.msk.f32.vlgmr.msra.gmra.mrb[0].mxu0 %vm359_vm8, %v358_v42 }
 0x1e4   : > { %v428_v47 = vpop.f32.mrb[0].mxu0 }
 0x1e5   : > { %v432_v48 = vmax.f32 %v428_v47, 0.0  ;;  %v776_v49 = vpop.f32.mrb[1].mxu0 }
 0x1e7   : > { %780 = vmatmul.mubr.msk.f32.vlgmr.msra.gmra.mrb[0].mxu1 %vm434_vm10, %v432_v48 }
 0x2ba   : > { %v508_v50 = vpop.f32.mrb[0].mxu1 }
 0x2bb   : > { %v739_v52 = vmul.f32 -1.442695, %v508_v50  ;;  %v781_v54 = vpop.f32.mrb[1].mxu1 }
 0x2bd   : > { %870 = vpow2.f32 %v739_v52 }
 0x2c7   : > { %v871_v55 = vpop.eup %870 }
 0x2c8   : > { %v515_v56 = vadd.f32 1.0, %v871_v55 }
 0x2ca   : > { %872 = vrcp.f32 %v515_v56 }
 0x2d4   : > { %v873_v58 = vpop.eup %872 }
 0x2d5   : > { %v521_v59 = vrot.slane %v873_v58, %v520_v57 }
 0x2d7   : > { %527 = vbcast.lane.b32.xlu1 %v521_v59, 264  ;;  %523 = vbcast.lane.b32.xlu0 %v521_v59, 256 }
 0x2db   : > { %531 = vbcast.lane.b32.xlu1 %v521_v59, 272  ;;  %539 = vbcast.lane.b32.xlu0 %v521_v59, 288 }
 0x2df   : > { %535 = vbcast.lane.b32.xlu1 %v521_v59, 280  ;;  %547 = vbcast.lane.b32.xlu0 %v521_v59, 304 }
 0x2e3   : > { %543 = vbcast.lane.b32.xlu1 %v521_v59, 296 }
 0x2e7   : > { %551 = vbcast.lane.b32.xlu1 %v521_v59, 312 }
 0x349   : > { %v528_v60 = vpop.permute.xlu1 %527  ;;  %v524_v61 = vpop.permute.xlu0 %523 }
 0x34a   : > { %v557_v62 = vmul.f32 %v528_v60, %v1271_v9  ;;  %v558_v63 = vmul.f32 %v528_v60, %v1278_v12  ;;  %v559_v3 = vmul.f32 %v528_v60, %v1281_v13  ;;  %v560_v25 = vmul.f32 %v528_v60, %v1297_v20 }
 0x34b   : > { %v553_v8 = vmul.f32 %v524_v61, %v1246_v0  ;;  %v554_v10 = vmul.f32 %v524_v61, %v1249_v1  ;;  %v555_v14 = vmul.f32 %v524_v61, %v1252_v2  ;;  %v556_v15 = vmul.f32 %v524_v61, %v1263_v6 }
 0x34c   : > { %589 = vst [vmem:[%s1394_s18 + $0x20] sm:$0xff] %v557_v62  ;;  %590 = vst [vmem:[%s1394_s18 + $0x28] sm:$0xff] %v558_v63 }
 0x34d   : > { %591 = vst [vmem:[%s1394_s18 + $0x30] sm:$0xff] %v559_v3  ;;  %592 = vst [vmem:[%s1394_s18 + $0x38] sm:$0xff] %v560_v25  ;;  %v532_v0 = vpop.permute.xlu1 %531  ;;  %v540_v1 = vpop.permute.xlu0 %539 }
 0x34e   : > { %585 = vst [vmem:[%s1394_s18] sm:$0xff] %v553_v8  ;;  %586 = vst [vmem:[%s1394_s18 + $0x8] sm:$0xff] %v554_v10  ;;  %v561_v2 = vmul.f32 %v532_v0, %v1257_v4  ;;  %v562_v6 = vmul.f32 %v532_v0, %v1260_v5  ;;  %v563_v9 = vmul.f32 %v532_v0, %v1266_v7 }
 0x34f   : > { %587 = vst [vmem:[%s1394_s18 + $0x10] sm:$0xff] %v555_v14  ;;  %588 = vst [vmem:[%s1394_s18 + $0x18] sm:$0xff] %v556_v15  ;;  %v564_v12 = vmul.f32 %v532_v0, %v1275_v11  ;;  %v569_v13 = vmul.f32 %v540_v1, %v1302_v22  ;;  %v570_v20 = vmul.f32 %v540_v1, %v1305_v23 }
 0x350   : > { %v571_v19 = vmul.f32 %v540_v1, %v1313_v27  ;;  %v572_v21 = vmul.f32 %v540_v1, %v1322_v31  ;;  %593 = vst [vmem:[%s1394_s18 + $0x40] sm:$0xff] %v561_v2  ;;  %594 = vst [vmem:[%s1394_s18 + $0x48] sm:$0xff] %v562_v6 }
 0x351   : > { %595 = vst [vmem:[%s1394_s18 + $0x50] sm:$0xff] %v563_v9  ;;  %596 = vst [vmem:[%s1394_s18 + $0x58] sm:$0xff] %v564_v12  ;;  %v536_v4 = vpop.permute.xlu1 %535  ;;  %v548_v5 = vpop.permute.xlu0 %547 }
 0x352   : > { %601 = vst [vmem:[%s1394_s18 + $0x80] sm:$0xff] %v569_v13  ;;  %602 = vst [vmem:[%s1394_s18 + $0x88] sm:$0xff] %v570_v20  ;;  %v565_v7 = vmul.f32 %v536_v4, %v1287_v16  ;;  %v566_v11 = vmul.f32 %v536_v4, %v1290_v17  ;;  %v567_v22 = vmul.f32 %v536_v4, %v1293_v18 }
 0x353   : > { %603 = vst [vmem:[%s1394_s18 + $0x90] sm:$0xff] %v571_v19  ;;  %604 = vst [vmem:[%s1394_s18 + $0x98] sm:$0xff] %v572_v21  ;;  %v568_v23 = vmul.f32 %v536_v4, %v1310_v26  ;;  %v577_v27 = vmul.f32 %v548_v5, %v1335_v37  ;;  %v578_v31 = vmul.f32 %v548_v5, %v1338_v38 }
 0x354   : > { %v579_v28 = vmul.f32 %v548_v5, %v1341_v39  ;;  %v580_v30 = vmul.f32 %v548_v5, %v1365_v51  ;;  %597 = vst [vmem:[%s1394_s18 + $0x60] sm:$0xff] %v565_v7  ;;  %598 = vst [vmem:[%s1394_s18 + $0x68] sm:$0xff] %v566_v11 }
 0x355   : > { %599 = vst [vmem:[%s1394_s18 + $0x70] sm:$0xff] %v567_v22  ;;  %600 = vst [vmem:[%s1394_s18 + $0x78] sm:$0xff] %v568_v23  ;;  %v544_v16 = vpop.permute.xlu1 %543 }
 0x356   : > { %609 = vst [vmem:[%s1394_s18 + $0xc0] sm:$0xff] %v577_v27  ;;  %610 = vst [vmem:[%s1394_s18 + $0xc8] sm:$0xff] %v578_v31  ;;  %v573_v17 = vmul.f32 %v544_v16, %v1318_v29  ;;  %v574_v18 = vmul.f32 %v544_v16, %v1325_v32  ;;  %v575_v26 = vmul.f32 %v544_v16, %v1328_v33 }
 0x357   : > { %611 = vst [vmem:[%s1394_s18 + $0xd0] sm:$0xff] %v579_v28  ;;  %612 = vst [vmem:[%s1394_s18 + $0xd8] sm:$0xff] %v580_v30  ;;  %v576_v37 = vmul.f32 %v544_v16, %v1345_v41 }
 0x358   : > { %605 = vst [vmem:[%s1394_s18 + $0xa0] sm:$0xff] %v573_v17  ;;  %606 = vst [vmem:[%s1394_s18 + $0xa8] sm:$0xff] %v574_v18 }
 0x359   : > { %607 = vst [vmem:[%s1394_s18 + $0xb0] sm:$0xff] %v575_v26  ;;  %608 = vst [vmem:[%s1394_s18 + $0xb8] sm:$0xff] %v576_v37  ;;  %v552_v38 = vpop.permute.xlu1 %551 }
 0x35a   : > { %v581_v29 = vmul.f32 %v552_v38, %v1350_v43  ;;  %v582_v32 = vmul.f32 %v552_v38, %v1353_v44  ;;  %v583_v33 = vmul.f32 %v552_v38, %v1357_v46  ;;  %v584_v39 = vmul.f32 %v552_v38, %v1369_v53 }
 0x35c   : > { %613 = vst [vmem:[%s1394_s18 + $0xe0] sm:$0xff] %v581_v29  ;;  %614 = vst [vmem:[%s1394_s18 + $0xe8] sm:$0xff] %v582_v32 }
 0x35d   : > { %615 = vst [vmem:[%s1394_s18 + $0xf0] sm:$0xff] %v583_v33  ;;  %616 = vst [vmem:[%s1394_s18 + $0xf8] sm:$0xff] %v584_v39 }
 0x35e   : > { %973 = shalt.err (!%p970_p7)
}
 0x35f   : > { %s974_s25 = scalar_lea.hbm %s1449_s27, 4096  ;;  %s978_s21 = scalar_lea.hbm %s1505_s3, 16384 }
 0x360   : > { %p975_p9 = scmp.ne.s32.totalorder %s1449_s27, %s974_s25  ;;  %p979_p5 = scmp.lt.u32.totalorder %s1449_s27, %s1505_s3 }
 0x361   : > { %p980_p10 = scmp.lt.u32.totalorder %s978_s21, %s974_s25  ;;  %p982_p1 = scmp.lt.u32.totalorder %s974_s25, %s1449_s27 }
 0x362   : > { %p976_p12 = pnand %p975_p9, %p1177_p4 }
 0x363   : > { %p981_p11 = por %p980_p10, %p979_p5 }
 0x364   : > { %p977_p0 = pneg %p976_p12 }
 0x365   : > { %p983_p2 = por %p982_p1, %p981_p11 }
 0x367   : > { %p984_p6 = pnand %p983_p2, %p977_p0 }
 0x369   : > { %987 = shalt.err (!%p984_p6)
}
 0x36a   : > { %s1043_s30 = smov 512   ;;  %s1044_s18 = smov 32  }
 0x36b   : > { %804 = dma.vmem_to_hbm [thread:$0]  (%p1177_p4), %s1451_s17, 4096, %s1449_s27, %s618_s16, %s1043_s30, %s1043_s30, %s1044_s18  }
 0x36c PF: > { %p826_p8 = scmp.ge.s32.totalorder %s1030_s15, 2  ;;  %s646_s20 = sand.u32 1, %s1018_s12  }
 0x36d   : > { %p1520_p13 = scmp.ne.s32.totalorder %s1510_s19, 0  ;;  %s647_s24 = scalar_lea.sflag [#allocation4], %s646_s20 }
 0x36f   : > { %p818_p3 = pnand %p826_p8, %p1520_p13 }
 0x371   : > { %1013 = dma.done.wait (!%p818_p3), %s647_s24, 4096  }
 0x372   : > { %1015 = vsyncadd (!%p818_p3), %s647_s24, 4294963200  ;;  %p17_p7 = scmp.ge.s32.totalorder %s1167_s4, 6   ;;  %s1521_s12 = smov %s1022_s13 }
 0x373   : > { %s1522_s13 = smov %s1026_s14  ;;  %s1523_s14 = smov %s1183_s7 }
 0x374   : > { %s1524_s15 = smov %s1167_s4  ;;  %19 = sbr.rel (!%p17_p7) target bundleno = 6 (0x6), region = 85 }
 0x37b   :  { %652 = vsyncpa [#allocation3], 1 }
 0x37c   :  { %654 = vsyncpa [#allocation3 + $0x1], 1 }
 0x37d   :  { %655 = vsyncpa [#allocation6], 1 }
 0x37e   :  { %656 = vsyncpa [#allocation4], 1 }
 0x37f   :  { %658 = vsyncpa [#allocation4 + $0x1], 1 }

</bundles_post_ra>
